<compile_context>
chip_gen: v5e
topology: v5e:2x2
jax: 0.10.0
libtpu: 0.0.40
codegen_flags: <defaults>
</compile_context>

<pallas_src>
import functools

import jax
import jax.numpy as jnp
from jax import lax
from jax.experimental import pallas as pl
from jax.experimental.pallas import tpu as pltpu


def _round_up(x, m):
    return ((x + m - 1) // m) * m


# --------------------------------------------------------------------------------------
# FAST PATH: VMEM-resident table, one-hot MXU gather, lane-dense output packing.
# --------------------------------------------------------------------------------------
def _onehot_gather_kernel(idx_ref, tab_ref, out_ref, *, groups):
    """One grid step: gather `rows*groups` tokens via one-hot @ (block-diag) table.

    idx_ref : (rows, groups) int32 VMEM -- token ids, already offset by slot*V
    tab_ref : (groups*V, lane) VMEM     -- block-diagonal table (resident across grid)
    out_ref : (rows, lane) VMEM         -- lane-dense output rows (lane = groups*H)
    """
    rows, _ = out_ref.shape
    cols = tab_ref.shape[0]                                   # groups * V
    col_ids = lax.broadcasted_iota(jnp.int32, (rows, cols), 1)

    # Build the (rows, cols) one-hot.  Each token's id already carries its slot*V
    # offset, so the `groups` comparisons hit disjoint column ranges.
    onehot = jnp.zeros((rows, cols), dtype=tab_ref.dtype)
    for j in range(groups):                                   # groups <= 16, small unroll
        onehot = onehot + (col_ids == idx_ref[:, j:j + 1]).astype(tab_ref.dtype)

    out_ref[...] = jnp.dot(
        onehot, tab_ref[...], preferred_element_type=jnp.float32
    ).astype(out_ref.dtype)


def _onehot_gather(idx_flat, table, *, tile_rows=256):
    """Gather rows of `table` for flat int32 ids using the VMEM-resident fast path."""
    v, h = table.shape
    dtype = table.dtype

    # Lane-dense packing factor: g tokens per 128-lane output row when H divides 128.
    groups = 128 // h if (h < 128 and 128 % h == 0) else 1
    lane = groups * h

    if groups > 1:
        # Block-diagonal expansion (pure JAX, once): row j*V + t holds table[t]
        # at lane offset j*H.  kron(I_g, table) is exactly that layout.
        tab = jnp.kron(jnp.eye(groups, dtype=dtype), table)   # (groups*V, lane)
    else:
        tab = table

    n = idx_flat.shape[0]
    r = -(-n // groups)                                       # output rows needed
    tile_rows = _round_up(max(16, min(tile_rows, _round_up(r, 16))), 16)
    r_pad = _round_up(r, tile_rows)
    n_pad = r_pad * groups
    if n_pad != n:
        idx_flat = jnp.pad(idx_flat, (0, n_pad - n))          # pad gathers row 0, sliced off

    # Per-slot id offset so one matmul against the block-diagonal table suffices.
    idx2 = idx_flat.reshape(r_pad, groups) + (
        jnp.arange(groups, dtype=jnp.int32) * v
    )[None, :]

    num_tiles = r_pad // tile_rows
    itemsize = jnp.dtype(dtype).itemsize
    bytes_accessed = int(r_pad * lane * itemsize + tab.size * itemsize + idx2.size * 4)

    out = pl.pallas_call(
        functools.partial(_onehot_gather_kernel, groups=groups),
        out_shape=jax.ShapeDtypeStruct((r_pad, lane), dtype),
        grid=(num_tiles,),
        in_specs=[
            pl.BlockSpec((tile_rows, groups), lambda t: (t, 0)),        # per-tile ids
            pl.BlockSpec((groups * v, lane), lambda t: (0, 0)),         # table resident
        ],
        out_specs=pl.BlockSpec((tile_rows, lane), lambda t: (t, 0)),    # lane-dense writeback
        compiler_params=pltpu.CompilerParams(
            dimension_semantics=("parallel",),                          # token tiles independent
        ),
        cost_estimate=pl.CostEstimate(
            flops=2 * r_pad * (groups * v) * lane,
            transcendentals=0,
            bytes_accessed=bytes_accessed,
        ),
    )(idx2, tab)

    # (r_pad, groups*H) rows hold `groups` consecutive tokens -> row-major unpack.
    return out.reshape(-1, h)[:n]


# --------------------------------------------------------------------------------------
# GATHER PATH: table stays in HBM, chunked double-buffered per-row DMA gather.
# --------------------------------------------------------------------------------------
def _hbm_gather_kernel(idx_ref, table_hbm, out_ref, sems, *, tile_n, chunk):
    """Gather `tile_n` embedding rows from the HBM table into this step's output block.

    idx_ref   : (n_pad,) int32 SMEM (scalar prefetch) -- flattened token ids
    table_hbm : (V, H) embedding table left in HBM (memory_space=pl.ANY)
    out_ref   : (tile_n, H) VMEM output block for grid step t
    sems      : (2, chunk) DMA semaphores -- 2-deep chunk pipeline
    """
    t = pl.program_id(0)
    base = t * tile_n
    n_chunks = tile_n // chunk

    def issue(c):
        slot = c % 2
        off = c * chunk
        for r in range(chunk):                                 # small, bounded unroll
            row = idx_ref[base + off + r]
            pltpu.make_async_copy(
                table_hbm.at[row], out_ref.at[off + r], sems.at[slot, r]
            ).start()

    def drain(c):
        slot = c % 2
        off = c * chunk
        for r in range(chunk):
            # src only fixes the byte count for the wait; any (H,) row works.
            pltpu.make_async_copy(
                table_hbm.at[0], out_ref.at[off + r], sems.at[slot, r]
            ).wait()

    issue(0)                                                   # prime the pipeline

    @pl.loop(0, n_chunks)
    def _(c):
        @pl.when(c + 1 < n_chunks)
        def _():
            issue(c + 1)                                       # keep next chunk in flight
        drain(c)


# Bound on tokens per pallas_call so the scalar-prefetch index array stays small in SMEM
# (1-D SMEM pads to next_pow2(4N) bytes); larger N is handled by segmenting in the wrapper.
_MAX_TOKENS_PER_GATHER_CALL = 32768


def _hbm_gather_segment(idx_flat, table, *, tile_n, chunk):
    v, h = table.shape
    itemsize = jnp.dtype(table.dtype).itemsize
    n = idx_flat.shape[0]

    # Keep the double-buffered output block comfortably inside scoped VMEM (v7x: 32 MiB).
    budget_rows = max(chunk, (8 << 20) // (2 * h * itemsize))
    tile_n = max(chunk, min(tile_n, budget_rows, _round_up(n, chunk)))
    tile_n = _round_up(tile_n, chunk)

    n_pad = _round_up(n, tile_n)
    if n_pad != n:
        idx_flat = jnp.pad(idx_flat, (0, n_pad - n))           # pad gathers row 0, sliced off

    grid = (n_pad // tile_n,)
    bytes_accessed = int(2 * n_pad * h * itemsize + n_pad * 4)

    # NOTE: output last dim = H; for H < 128 the writeback is lane-sparse, but this path
    # is only used for huge tables where the per-row HBM reads dominate anyway.
    # TODO(synk): consider pl.Buffered(3) on out_specs for v7x to expose more DMA overlap.
    out = pl.pallas_call(
        functools.partial(_hbm_gather_kernel, tile_n=tile_n, chunk=chunk),
        out_shape=jax.ShapeDtypeStruct((n_pad, h), table.dtype),
        grid_spec=pltpu.PrefetchScalarGridSpec(
            num_scalar_prefetch=1,                              # idx -> SMEM
            grid=grid,
            in_specs=[pl.BlockSpec(memory_space=pl.ANY)],       # table stays in HBM
            out_specs=pl.BlockSpec((tile_n, h), lambda t, idx_ref: (t, 0)),
            scratch_shapes=[pltpu.SemaphoreType.DMA((2, chunk))],
        ),
        compiler_params=pltpu.CompilerParams(
            dimension_semantics=("parallel",),                  # shard token tiles across TCs
        ),
        cost_estimate=pl.CostEstimate(
            flops=0, transcendentals=0, bytes_accessed=bytes_accessed
        ),
    )(idx_flat, table)
    return out[:n]


# --------------------------------------------------------------------------------------
# Public wrapper == nn.Embedding.forward : out[..., :] = table[x[...], :]
# --------------------------------------------------------------------------------------
def embedding_forward(x, table, *, force_hbm_gather=False, tile_n=512, chunk=16,
                      tile_rows=256):
    orig_shape = x.shape
    v, h = table.shape

    idx = x.reshape(-1).astype(jnp.int32)
    # OOB policy: clamp (torch raises). Documented deviation; keeps all sources in-range.
    idx = jnp.clip(idx, 0, v - 1)
    n = idx.shape[0]

    groups = 128 // h if (h < 128 and 128 % h == 0) else 1
    dense_bytes = (groups * v) * (groups * h) * jnp.dtype(table.dtype).itemsize
    use_fast = (not force_hbm_gather) and (v <= 1024) and (dense_bytes <= (4 << 20))

    if use_fast:
        out = _onehot_gather(idx, table, tile_rows=tile_rows)
    else:
        segs = []
        for s in range(0, n, _MAX_TOKENS_PER_GATHER_CALL):
            segs.append(
                _hbm_gather_segment(
                    idx[s:s + _MAX_TOKENS_PER_GATHER_CALL], table,
                    tile_n=tile_n, chunk=chunk,
                )
            )
        out = segs[0] if len(segs) == 1 else jnp.concatenate(segs, axis=0)

    return out.reshape(*orig_shape, h)


if __name__ == "__main__":
    # Module config (small, consistent with the forward pass):
    graph_size = 16   # vocabulary / number of graph nodes
    h_size = 32       # embedding width
    batch, seq = 2, 8

    key = jax.random.PRNGKey(0)
    k_tab, k_idx = jax.random.split(key)

    # Deterministic parameter init, matching nn.Embedding's default N(0, 1).
    table = jax.random.normal(k_tab, (graph_size, h_size), dtype=jnp.float32)
    # Deterministic integer inputs in [0, graph_size).
    x = jax.random.randint(k_idx, (batch, seq), 0, graph_size, dtype=jnp.int32)

    ref = jnp.take(table, x, axis=0)   # torch.nn.Embedding semantics

    # Fast path: VMEM-resident table, lane-dense one-hot MXU gather.
    y_fast = jax.block_until_ready(embedding_forward(x, table))
    assert y_fast.shape == (batch, seq, h_size), y_fast.shape
    assert jnp.allclose(y_fast, ref), "fast path mismatch vs reference gather"

    # Gather path (exercised explicitly): table in HBM, chunked pipelined row DMAs.
    y_gather = jax.block_until_ready(embedding_forward(x, table, force_hbm_gather=True))
    assert y_gather.shape == (batch, seq, h_size), y_gather.shape
    assert jnp.allclose(y_gather, ref), "HBM-gather path mismatch vs reference gather"

    print("KERNEL_OK")
</pallas_src>

<mosaic_0001>
module attributes {stable_mosaic.version = 11 : i64} {
  func.func @_onehot_gather_kernel(%arg0: i32, %arg1: memref<16x4xi32, #tpu.memory_space<vmem>>, %arg2: memref<64x128xf32, #tpu.memory_space<vmem>>, %arg3: memref<16x128xf32, #tpu.memory_space<vmem>>) attributes {dimension_semantics = [#tpu.dimension_semantics<parallel>], iteration_bounds = array<i64: 1>, scalar_prefetch = 0 : i64, scratch_operands = 0 : i64, tpu.core_type = #tpu.core_type<tc>, window_params = [{transform_indices = @transform_0, window_bounds = array<i64: 16, 4>}, {pipeline_mode = #tpu.pipeline_mode<synchronous>, transform_indices = @transform_1, window_bounds = array<i64: 64, 128>}, {transform_indices = @transform_2, window_bounds = array<i64: 16, 128>}]} {
    %0 = tpu.iota {dimensions = array<i32: 1>} : vector<16x64xi32>
    %cst = arith.constant 0.000000e+00 : f32
    %1 = vector.broadcast %cst : f32 to vector<16x64xf32>
    %c0 = arith.constant 0 : index
    %c0_0 = arith.constant 0 : index
    %2 = vector.load %arg1[%c0, %c0_0] : memref<16x4xi32, #tpu.memory_space<vmem>>, vector<16x1xi32>
    %3 = vector.broadcast %2 : vector<16x1xi32> to vector<16x64xi32>
    %4 = arith.cmpi eq, %0, %3 : vector<16x64xi32>
    %5 = arith.extui %4 : vector<16x64xi1> to vector<16x64xi32>
    %6 = arith.sitofp %5 : vector<16x64xi32> to vector<16x64xf32>
    %7 = arith.addf %1, %6 : vector<16x64xf32>
    %c0_1 = arith.constant 0 : index
    %c1 = arith.constant 1 : index
    %8 = vector.load %arg1[%c0_1, %c1] : memref<16x4xi32, #tpu.memory_space<vmem>>, vector<16x1xi32>
    %9 = vector.broadcast %8 : vector<16x1xi32> to vector<16x64xi32>
    %10 = arith.cmpi eq, %0, %9 : vector<16x64xi32>
    %11 = arith.extui %10 : vector<16x64xi1> to vector<16x64xi32>
    %12 = arith.sitofp %11 : vector<16x64xi32> to vector<16x64xf32>
    %13 = arith.addf %7, %12 : vector<16x64xf32>
    %c0_2 = arith.constant 0 : index
    %c2 = arith.constant 2 : index
    %14 = vector.load %arg1[%c0_2, %c2] : memref<16x4xi32, #tpu.memory_space<vmem>>, vector<16x1xi32>
    %15 = vector.broadcast %14 : vector<16x1xi32> to vector<16x64xi32>
    %16 = arith.cmpi eq, %0, %15 : vector<16x64xi32>
    %17 = arith.extui %16 : vector<16x64xi1> to vector<16x64xi32>
    %18 = arith.sitofp %17 : vector<16x64xi32> to vector<16x64xf32>
    %19 = arith.addf %13, %18 : vector<16x64xf32>
    %c0_3 = arith.constant 0 : index
    %c3 = arith.constant 3 : index
    %20 = vector.load %arg1[%c0_3, %c3] : memref<16x4xi32, #tpu.memory_space<vmem>>, vector<16x1xi32>
    %21 = vector.broadcast %20 : vector<16x1xi32> to vector<16x64xi32>
    %22 = arith.cmpi eq, %0, %21 : vector<16x64xi32>
    %23 = arith.extui %22 : vector<16x64xi1> to vector<16x64xi32>
    %24 = arith.sitofp %23 : vector<16x64xi32> to vector<16x64xf32>
    %25 = arith.addf %19, %24 : vector<16x64xf32>
    %c0_4 = arith.constant 0 : index
    %c0_5 = arith.constant 0 : index
    %26 = vector.load %arg2[%c0_4, %c0_5] : memref<64x128xf32, #tpu.memory_space<vmem>>, vector<64x128xf32>
    %cst_6 = arith.constant dense<0.000000e+00> : vector<16x128xf32>
    %27 = tpu.matmul %25, %26, %cst_6 {dimension_numbers = #tpu.dot_dimension_numbers<[1], [0], [0], [1], [0, 0, 1, 1], [], []>} : vector<16x64xf32>, vector<64x128xf32>, vector<16x128xf32> -> vector<16x128xf32>
    %c0_7 = arith.constant 0 : index
    %c0_8 = arith.constant 0 : index
    %28 = vector.load %arg3[%c0_7, %c0_8] : memref<16x128xf32, #tpu.memory_space<vmem>>, vector<16x128xf32>
    tpu.vector_store %arg3[%c0_7, %c0_8], %27 {strides = array<i32>} : memref<16x128xf32, #tpu.memory_space<vmem>>, vector<16x128xf32>,
    return
  }
  func.func @transform_0(%arg0: i32) -> (i32, i32) {
    %c0_i32 = arith.constant 0 : i32
    %c0_i32_0 = arith.constant 0 : i32
    return %arg0, %c0_i32 : i32, i32
  }
  func.func @transform_1(%arg0: i32) -> (i32, i32) {
    %c0_i32 = arith.constant 0 : i32
    %c0_i32_0 = arith.constant 0 : i32
    %c0_i32_1 = arith.constant 0 : i32
    return %c0_i32, %c0_i32_0 : i32, i32
  }
  func.func @transform_2(%arg0: i32) -> (i32, i32) {
    %c0_i32 = arith.constant 0 : i32
    %c0_i32_0 = arith.constant 0 : i32
    return %arg0, %c0_i32 : i32, i32
  }
}

</mosaic_0001>

<bundles_post_ra>
// kernel: tpu_custom_call.1
= control target key start
LH: loop header
LB: loop body
LE: loop exit
PB: predicated region body
PF: predicated region fallthrough
CT: control target
= control target key end

     0   :  { %7 = vsyncpa [#allocation3], 0  ;;  %s273_s0 = inlined_call_operand.vmem [shape: s32[16,4], index: 0, kind: input, shape index: {}]   ;;  %s274_s1 = inlined_call_operand.hbm [shape: f32[64,128], index: 1, kind: input, shape index: {}]   ;;  %s275_s2 = inlined_call_operand.hbm [shape: f32[16,128], index: 2, kind: output, shape index: {}]  }
   0x1   :  { %8 = vsyncpa [#allocation4], 0  ;;  %s15_s11 = sshll.u32 %s274_s1, 4  ;;  %s231_s12 = smov [#allocation2]   ;;  %s16_s11 = int_to_ptr.hbm [resolvable:$true] %s15_s11 }
   0x2   :  { %s17_s13 = sshll.u32 %s231_s12, 4  ;;  %s232_s14 = smov 128   ;;  %s18_s13 = int_to_ptr.vmem [resolvable:$true] %s17_s13 }
   0x3   :  { %s233_s15 = smov 8  }
   0x4   :  { %23 = dma.hbm_to_vmem [thread:$0]  %s16_s11, 1024, %s18_s13, [#allocation3], %s232_s14, %s232_s14, %s233_s15  }
   0x5   :  { %227 = dma.done.wait [#allocation3], 1024  }
   0x6   :  { %228 = vsyncadd [#allocation3], 4294966272  ;;  %v234_v0 = vmov 1   ;;  %v235_v1 = vmov 0   ;;  %v236_v2 = vmov 2   ;;  %v30_v3 = vld [vmem:[%s273_s0] sm:$0xff]  ;;  %v28_v14 = vlaneseq }
   0x7   :  { %175 = vset.pattern.permute.xlu1 %v234_v0  ;;  %174 = vset.pattern.permute.xlu0 %v235_v1  ;;  %v31_v4 = vld [vmem:[%s273_s0 + $0x8] sm:$0xff]  ;;  %v237_v5 = vmov 3   ;;  %v95_v6 = vld [vmem:[#allocation2 + $0x38] sm:$0xff]  ;;  %v94_v7 = vld [vmem:[#allocation2 + $0x30] sm:$0xff]  ;;  %v238_v21 = vmov 0.0   ;;  %vm96_vm8 = vcmask 523264  }
   0x8   :  { %176 = vset.pattern.permute.xlu2 %v236_v2  ;;  %47 = vperm.xlu1 %175, %v30_v3   ;;  %v93_v8 = vld [vmem:[#allocation2 + $0x28] sm:$0xff]  ;;  %v92_v9 = vld [vmem:[#allocation2 + $0x20] sm:$0xff]  ;;  %v91_v10 = vld [vmem:[#allocation2 + $0x18] sm:$0xff]  ;;  %v29_v18 = vand.u32 127, %v28_v14  ;;  %s239_s0 = smov [#allocation5]   ;;  %s134_s22 = sshll.u32 %s275_s2, 4  ;;  %s135_s22 = int_to_ptr.hbm [resolvable:$true] %s134_s22 }
   0x9   :  { %33 = vperm.xlu0 %174, %v30_v3   ;;  %61 = vperm.xlu2 %176, %v30_v3   ;;  %v90_v11 = vld [vmem:[#allocation2 + $0x10] sm:$0xff]  ;;  %v89_v12 = vld [vmem:[#allocation2 + $0x8] sm:$0xff]  ;;  %v88_v13 = vld [vmem:[#allocation2] sm:$0xff]  ;;  %s132_s19 = sshll.u32 %s239_s0, 4  ;;  %s133_s19 = int_to_ptr.vmem [resolvable:$true] %s132_s19 }
   0xa   :  { %111 = vmatpush.msra.mxu0 %v95_v6  ;;  %157 = vmatpush.msra.mxu1 %v95_v6 }
   0xc   :  { %112 = vmatpush.msra.mxu0 %v94_v7  ;;  %158 = vmatpush.msra.mxu1 %v94_v7 }
   0xe   :  { %113 = vmatpush.msra.mxu0 %v93_v8  ;;  %159 = vmatpush.msra.mxu1 %v93_v8 }
  0x10   :  { %50 = vperm.xlu1 %175, %v31_v4   ;;  %114 = vmatpush.msra.mxu0 %v92_v9 }
  0x11   :  { %36 = vperm.xlu0 %174, %v31_v4   ;;  %64 = vperm.xlu2 %176, %v31_v4  }
  0x12   :  { %160 = vmatpush.msra.mxu1 %v92_v9  ;;  %115 = vmatpush.msra.mxu0 %v91_v10 }
  0x14   :  { %161 = vmatpush.msra.mxu1 %v91_v10  ;;  %116 = vmatpush.msra.mxu0 %v90_v11 }
  0x16   :  { %162 = vmatpush.msra.mxu1 %v90_v11  ;;  %117 = vmatpush.msra.mxu0 %v89_v12 }
  0x18   :  { %178 = vset.pattern.permute.xlu1 %v237_v5  ;;  %163 = vmatpush.msra.mxu1 %v89_v12 }
  0x19   :  { %177 = vset.pattern.permute.xlu0 %v237_v5  ;;  %78 = vperm.xlu1 %178, %v31_v4  }
  0x1a   :  { %75 = vperm.xlu0 %177, %v30_v3   ;;  %118 = vmatpush.msra.mxu0 %v88_v13 }
  0x1b   :  { %164 = vmatpush.msra.mxu1 %v88_v13 }
  0x63   :  { %v62_v17 = vpop.permute.xlu2 %61 }
  0x64   :  { %vm66_vm4 = vcmp.eq.s32.totalorder %v29_v18, %v62_v17 }
  0x65   :  { %v151_v29 = vsel %vm66_vm4, 1.0, %v238_v21 }
  0x6b   :  { %v65_v24 = vpop.permute.xlu2 %64 }
  0x6c   :  { %vm67_vm5 = vcmp.eq.s32.totalorder %v29_v18, %v65_v24 }
  0x6d   :  { %v152_v30 = vsel %vm67_vm5, 1.0, %v238_v21 }
  0x7a   :  { %v48_v15 = vpop.permute.xlu1 %47 }
  0x7b   :  { %v34_v16 = vpop.permute.xlu0 %33  ;;  %vm52_vm0 = vcmp.eq.s32.totalorder %v29_v18, %v48_v15 }
  0x7c   :  { %vm38_vm1 = vcmp.eq.s32.totalorder %v29_v18, %v34_v16  ;;  %v149_v22 = vsel %vm52_vm0, 1.0, %v238_v21 }
  0x7d   :  { %v147_v23 = vsel %vm38_vm1, 1.0, %v238_v21 }
  0x7e   :  { %v58_v27 = vadd.f32 %v149_v22, %v147_v23 }
  0x80   :  { %v72_v34 = vadd.f32 %v151_v29, %v58_v27 }
  0x82   :  { %v51_v19 = vpop.permute.xlu1 %50 }
  0x83   :  { %v37_v20 = vpop.permute.xlu0 %36  ;;  %vm53_vm2 = vcmp.eq.s32.totalorder %v29_v18, %v51_v19 }
  0x84   :  { %vm39_vm3 = vcmp.eq.s32.totalorder %v29_v18, %v37_v20  ;;  %v150_v25 = vsel %vm53_vm2, 1.0, %v238_v21 }
  0x85   :  { %v148_v26 = vsel %vm39_vm3, 1.0, %v238_v21 }
  0x86   :  { %v59_v28 = vadd.f32 %v150_v25, %v148_v26 }
  0x88   :  { %v73_v33 = vadd.f32 %v152_v30, %v59_v28 }
  0x8b   :  { %v79_v31 = vpop.permute.xlu1 %78 }
  0x8c   :  { %v76_v32 = vpop.permute.xlu0 %75  ;;  %vm81_vm6 = vcmp.eq.s32.totalorder %v29_v18, %v79_v31 }
  0x8d   :  { %vm80_vm7 = vcmp.eq.s32.totalorder %v29_v18, %v76_v32  ;;  %v154_v35 = vsel %vm81_vm6, 1.0, %v238_v21 }
  0x8e   :  { %v153_v36 = vsel %vm80_vm7, 1.0, %v238_v21  ;;  %v87_v37 = vadd.f32 %v154_v35, %v73_v33 }
  0x8f   :  { %v86_v38 = vadd.f32 %v153_v36, %v72_v34 }
  0x90   :  { %156 = vmatmul.msk.f32.vlgmr.msra.gmra.mxu1 %vm96_vm8, %v87_v37 }
  0x91   :  { %155 = vmatmul.msk.f32.vlgmr.msra.gmra.mxu0 %vm96_vm8, %v86_v38 }
 0x10d   :  { %v123_v40 = vpop.f32.mrf.mxu1 }
 0x10e   :  { %v120_v39 = vpop.f32.mrf.mxu0  ;;  %127 = vst [vmem:[#allocation5 + $0x8] sm:$0xff] %v123_v40 }
 0x10f   :  { %126 = vst [vmem:[#allocation5] sm:$0xff] %v120_v39 }
 0x110   :  { %140 = dma.vmem_to_hbm [thread:$0]  %s133_s19, 256, %s135_s22, [#allocation4], %s232_s14, %s232_s14, %s233_s15  }
 0x111   :  { %229 = dma.done.wait [#allocation4], 256  }
 0x112   :  { %230 = vsyncadd [#allocation4], 4294967040 }
 0x113   :  { %145 = vsyncpa [#allocation3], 1 }
 0x114   :  { %146 = vsyncpa [#allocation4], 1 }

</bundles_post_ra>
